<compile_context>
chip_gen: v6e
topology: v6e:2x2x1
jax: 0.10.0
libtpu: 0.0.40
codegen_flags: <defaults>
</compile_context>

<pallas_src>
import functools

import jax
import jax.numpy as jnp
from jax.experimental import pallas as pl
from jax.experimental.pallas import tpu as pltpu


def _label_smoothing_kernel(pred_ref, tgt_ref, partial_ref, *,
                            confidence: float, off_weight: float,
                            n_rows: int, tm: int):
    """One (tm, C) logits tile + (tm, 1) targets -> (1, 1) partial loss sum."""
    i = pl.program_id(0)
    x = pred_ref[...].astype(jnp.float32)                    # (tm, C)
    tgt = tgt_ref[...]                                       # (tm, 1) int32
    c = x.shape[-1]

    # Numerically stable log-sum-exp over the class (lane) axis; logp is never
    # materialized as a (tm, C) temporary.
    m = jnp.max(x, axis=-1, keepdims=True)                   # (tm, 1)
    lse = jnp.log(jnp.sum(jnp.exp(x - m), axis=-1, keepdims=True)) + m

    sum_x = jnp.sum(x, axis=-1, keepdims=True)               # (tm, 1)
    col = jax.lax.broadcasted_iota(jnp.int32, x.shape, 1)    # class id per lane
    tgt_x = jnp.sum(jnp.where(col == tgt, x, 0.0),
                    axis=-1, keepdims=True)                  # (tm, 1)

    loss = (-(confidence - off_weight) * (tgt_x - lse)
            - off_weight * (sum_x - float(c) * lse))         # (tm, 1)

    # Last tile may be partial: rows >= n_rows contain garbage -> select 0.
    row = jax.lax.broadcasted_iota(jnp.int32, (tm, 1), 0) + i * tm
    loss = jnp.where(row < n_rows, loss, 0.0)

    partial_ref[0] = jnp.sum(loss, axis=0, keepdims=True)    # (1, 1) into (1,1,1)


def _round_up(a: int, b: int) -> int:
    return ((a + b - 1) // b) * b


def _vmem_capacity_bytes() -> int:
    try:
        return int(pltpu.get_tpu_info().vmem_capacity_bytes)
    except Exception:
        return 64 * 1024 * 1024  # conservative (v7x-sized) fallback


def _select_row_tile(n_rows: int, n_classes: int, itemsize: int):
    """Pick a row tile from a generation-aware VMEM byte budget."""
    vmem_cap = _vmem_capacity_bytes()
    if vmem_cap >= 96 * 1024 * 1024:          # v5e / v6e: 128 MiB physical VMEM
        budget = 80 * 1024 * 1024
        limit = 100 * 1024 * 1024
    else:                                     # v7x: 64 MiB per TensorCore
        budget = 28 * 1024 * 1024
        limit = 48 * 1024 * 1024

    # Sublane quantum per input dtype (f32:8, bf16:16, int8/fp8:32).
    sub = {4: 8, 2: 16, 1: 32}.get(itemsize, 8)

    # VMEM bytes per tile row:
    #   double-buffered pred block + ~3 f32 working copies of the block
    #   + double-buffered (tm,1) target block lane-padded to 128 lanes.
    bytes_per_row = 2 * n_classes * itemsize + 3 * n_classes * 4 + 2 * 128 * 4
    tm = max(sub, budget // bytes_per_row)
    tm = min(tm, 4096)
    # Keep >= ~8 grid steps when the batch allows (pipelining + v7x megacore).
    steps_cap = _round_up(-(-n_rows // 8), sub)
    tm = min(tm, max(sub, steps_cap))
    tm = max(sub, (tm // sub) * sub)
    return tm, limit


def label_smoothing_loss(pred: jax.Array, target: jax.Array, *,
                         classes: int | None = None,
                         smoothing: float = 0.0,
                         dim: int = -1) -> jax.Array:
    """Pallas TPU implementation of LabelSmoothingLoss.forward."""
    assert pred.ndim == 2, "pred must be (batch, classes) like the PyTorch module"
    assert dim in (-1, 1), "class axis must be the last axis (module default)"
    N, C = pred.shape
    if classes is None:
        classes = C
    assert classes == C, "classes must equal pred.shape[1] to match the PyTorch module"
    confidence = 1.0 - smoothing
    off_weight = smoothing / (classes - 1) if classes > 1 else 0.0

    tgt2d = target.astype(jnp.int32).reshape(N, 1)
    itemsize = jnp.dtype(pred.dtype).itemsize
    tm, vmem_limit = _select_row_tile(N, C, itemsize)
    num_tiles = pl.cdiv(N, tm)

    kernel = functools.partial(_label_smoothing_kernel,
                               confidence=float(confidence),
                               off_weight=float(off_weight),
                               n_rows=N, tm=tm)

    cost = pl.CostEstimate(
        flops=6 * N * C,
        transcendentals=N * C + N,
        bytes_accessed=N * C * itemsize + N * 4 + num_tiles * 4,
    )

    partials = pl.pallas_call(
        kernel,
        out_shape=jax.ShapeDtypeStruct((num_tiles, 1, 1), jnp.float32),
        grid_spec=pltpu.PrefetchScalarGridSpec(
            num_scalar_prefetch=0,
            grid=(num_tiles,),
            in_specs=[
                pl.BlockSpec((tm, C), lambda i: (i, 0)),   # logits tile
                pl.BlockSpec((tm, 1), lambda i: (i, 0)),   # targets tile
            ],
            out_specs=pl.BlockSpec((1, 1, 1), lambda i: (i, 0, 0)),
        ),
        compiler_params=pltpu.CompilerParams(
            dimension_semantics=("parallel",),
            vmem_limit_bytes=vmem_limit,
        ),
        cost_estimate=cost,
    )(pred, tgt2d)

    return jnp.sum(partials) / N


def _label_smoothing_ref(pred, target, *, classes, smoothing, dim=-1):
    """Pure-JAX reference mirroring the PyTorch forward."""
    logp = jax.nn.log_softmax(pred, axis=dim)
    confidence = 1.0 - smoothing
    true_dist = jnp.full_like(logp, smoothing / (classes - 1) if classes > 1 else 0.0)
    true_dist = true_dist.at[jnp.arange(pred.shape[0]), target].set(confidence)
    return jnp.mean(jnp.sum(-true_dist * logp, axis=dim))


if __name__ == "__main__":
    key = jax.random.PRNGKey(0)
    k1, k2, k3, k4, k5, k6 = jax.random.split(key, 6)

    # Small shapes consistent with the module: batch of logits over a few classes.
    N, C = 16, 5
    smoothing = 0.1
    pred = jax.random.normal(k1, (N, C), dtype=jnp.float32)
    target = jax.random.randint(k2, (N,), 0, C, dtype=jnp.int32)
    out = jax.block_until_ready(
        label_smoothing_loss(pred, target, classes=C, smoothing=smoothing))
    ref = _label_smoothing_ref(pred, target, classes=C, smoothing=smoothing)
    assert out.shape == ()
    assert jnp.allclose(out, ref, atol=1e-5, rtol=1e-5), (out, ref)

    # Batch not a multiple of the tile (partial last tile), smoothing = 0 (plain NLL).
    N2, C2 = 37, 8
    pred2 = jax.random.normal(k3, (N2, C2), dtype=jnp.float32)
    target2 = jax.random.randint(k4, (N2,), 0, C2, dtype=jnp.int32)
    out2 = jax.block_until_ready(
        label_smoothing_loss(pred2, target2, classes=C2, smoothing=0.0))
    ref2 = _label_smoothing_ref(pred2, target2, classes=C2, smoothing=0.0)
    assert jnp.allclose(out2, ref2, atol=1e-5, rtol=1e-5), (out2, ref2)

    # bf16 logits kept in bf16 through the BlockSpec (cast inside the kernel).
    N3, C3 = 64, 16
    pred3 = jax.random.normal(k5, (N3, C3), dtype=jnp.float32).astype(jnp.bfloat16)
    target3 = jax.random.randint(k6, (N3,), 0, C3, dtype=jnp.int32)
    out3 = jax.block_until_ready(
        label_smoothing_loss(pred3, target3, classes=C3, smoothing=0.2))
    ref3 = _label_smoothing_ref(pred3.astype(jnp.float32), target3,
                                classes=C3, smoothing=0.2)
    assert jnp.allclose(out3, ref3, atol=1e-4, rtol=1e-4), (out3, ref3)

    print("KERNEL_OK")
</pallas_src>

<mosaic_0001>
module attributes {stable_mosaic.version = 11 : i64} {
  func.func @_label_smoothing_kernel(%arg0: i32, %arg1: memref<8x5xf32, #tpu.memory_space<vmem>>, %arg2: memref<8x1xi32, #tpu.memory_space<vmem>>, %arg3: memref<1x1x1xf32, #tpu.memory_space<vmem>>) attributes {dimension_semantics = [#tpu.dimension_semantics<parallel>], iteration_bounds = array<i64: 2>, scalar_prefetch = 0 : i64, scratch_operands = 0 : i64, tpu.core_type = #tpu.core_type<tc>, window_params = [{transform_indices = @transform_0, window_bounds = array<i64: 8, 5>}, {transform_indices = @transform_1, window_bounds = array<i64: 8, 1>}, {transform_indices = @transform_2, window_bounds = array<i64: 1, 1, 1>}]} {
    %c0 = arith.constant 0 : index
    %c0_0 = arith.constant 0 : index
    %0 = vector.load %arg1[%c0, %c0_0] : memref<8x5xf32, #tpu.memory_space<vmem>>, vector<8x5xf32>
    %c0_1 = arith.constant 0 : index
    %c0_2 = arith.constant 0 : index
    %1 = vector.load %arg2[%c0_1, %c0_2] : memref<8x1xi32, #tpu.memory_space<vmem>>, vector<8x1xi32>
    %cst = arith.constant dense<0xFF800000> : vector<8xf32>
    %2 = vector.multi_reduction <maximumf>, %0, %cst [1] : vector<8x5xf32> to vector<8xf32>
    %3 = vector.shape_cast %2 : vector<8xf32> to vector<8x1xf32>
    %4 = vector.broadcast %3 : vector<8x1xf32> to vector<8x5xf32>
    %5 = arith.subf %0, %4 : vector<8x5xf32>
    %6 = math.exp %5 : vector<8x5xf32>
    %cst_3 = arith.constant dense<0.000000e+00> : vector<8xf32>
    %7 = vector.multi_reduction <add>, %6, %cst_3 [1] : vector<8x5xf32> to vector<8xf32>
    %8 = vector.shape_cast %7 : vector<8xf32> to vector<8x1xf32>
    %9 = math.log %8 : vector<8x1xf32>
    %10 = arith.addf %9, %3 : vector<8x1xf32>
    %cst_4 = arith.constant dense<0.000000e+00> : vector<8xf32>
    %11 = vector.multi_reduction <add>, %0, %cst_4 [1] : vector<8x5xf32> to vector<8xf32>
    %12 = vector.shape_cast %11 : vector<8xf32> to vector<8x1xf32>
    %13 = tpu.iota {dimensions = array<i32: 1>} : vector<8x5xi32>
    %14 = vector.broadcast %1 : vector<8x1xi32> to vector<8x5xi32>
    %15 = arith.cmpi eq, %13, %14 : vector<8x5xi32>
    %cst_5 = arith.constant 0.000000e+00 : f32
    %16 = vector.broadcast %cst_5 : f32 to vector<8x5xf32>
    %17 = arith.select %15, %0, %16 : vector<8x5xi1>, vector<8x5xf32>
    %cst_6 = arith.constant dense<0.000000e+00> : vector<8xf32>
    %18 = vector.multi_reduction <add>, %17, %cst_6 [1] : vector<8x5xf32> to vector<8xf32>
    %19 = vector.shape_cast %18 : vector<8xf32> to vector<8x1xf32>
    %20 = arith.subf %19, %10 : vector<8x1xf32>
    %cst_7 = arith.constant -8.750000e-01 : f32
    %21 = vector.broadcast %cst_7 : f32 to vector<8x1xf32>
    %22 = arith.mulf %21, %20 : vector<8x1xf32>
    %cst_8 = arith.constant 5.000000e+00 : f32
    %23 = vector.broadcast %cst_8 : f32 to vector<8x1xf32>
    %24 = arith.mulf %23, %10 : vector<8x1xf32>
    %25 = arith.subf %12, %24 : vector<8x1xf32>
    %cst_9 = arith.constant 2.500000e-02 : f32
    %26 = vector.broadcast %cst_9 : f32 to vector<8x1xf32>
    %27 = arith.mulf %26, %25 : vector<8x1xf32>
    %28 = arith.subf %22, %27 : vector<8x1xf32>
    %29 = tpu.iota {dimensions = array<i32: 0>} : vector<8x1xi32>
    %c8_i32 = arith.constant 8 : i32
    %30 = arith.muli %arg0, %c8_i32 : i32
    %31 = vector.broadcast %30 : i32 to vector<8x1xi32>
    %32 = arith.addi %29, %31 : vector<8x1xi32>
    %c16_i32 = arith.constant 16 : i32
    %33 = vector.broadcast %c16_i32 : i32 to vector<8x1xi32>
    %34 = arith.cmpi slt, %32, %33 : vector<8x1xi32>
    %cst_10 = arith.constant 0.000000e+00 : f32
    %35 = vector.broadcast %cst_10 : f32 to vector<8x1xf32>
    %36 = arith.select %34, %28, %35 : vector<8x1xi1>, vector<8x1xf32>
    %cst_11 = arith.constant dense<0.000000e+00> : vector<1xf32>
    %37 = vector.multi_reduction <add>, %36, %cst_11 [0] : vector<8x1xf32> to vector<1xf32>
    %38 = vector.shape_cast %37 : vector<1xf32> to vector<1x1xf32>
    %c0_12 = arith.constant 0 : index
    %c0_13 = arith.constant 0 : index
    %c0_14 = arith.constant 0 : index
    %39 = vector.load %arg3[%c0_12, %c0_13, %c0_14] : memref<1x1x1xf32, #tpu.memory_space<vmem>>, vector<1x1x1xf32>
    %40 = vector.shape_cast %39 : vector<1x1x1xf32> to vector<1x1xf32>
    %41 = vector.shape_cast %38 : vector<1x1xf32> to vector<1x1x1xf32>
    tpu.vector_store %arg3[%c0_12, %c0_13, %c0_14], %41 {strides = array<i32>} : memref<1x1x1xf32, #tpu.memory_space<vmem>>, vector<1x1x1xf32>,
    return
  }
  func.func @transform_0(%arg0: i32) -> (i32, i32) {
    %c0_i32 = arith.constant 0 : i32
    %c0_i32_0 = arith.constant 0 : i32
    return %arg0, %c0_i32 : i32, i32
  }
  func.func @transform_1(%arg0: i32) -> (i32, i32) {
    %c0_i32 = arith.constant 0 : i32
    %c0_i32_0 = arith.constant 0 : i32
    return %arg0, %c0_i32 : i32, i32
  }
  func.func @transform_2(%arg0: i32) -> (i32, i32, i32) {
    %c0_i32 = arith.constant 0 : i32
    %c0_i32_0 = arith.constant 0 : i32
    %c0_i32_1 = arith.constant 0 : i32
    return %arg0, %c0_i32, %c0_i32_0 : i32, i32, i32
  }
}

</mosaic_0001>

<bundles_post_ra>
// kernel: tpu_custom_call.1
= control target key start
LH: loop header
LB: loop body
LE: loop exit
PB: predicated region body
PF: predicated region fallthrough
CT: control target
= control target key end

     0   :  { %s310_s9 = smov 0   ;;  %s343_s0 = inlined_call_operand.vmem [shape: f32[16,5], index: 0, kind: input, shape index: {}]   ;;  %s344_s1 = inlined_call_operand.vmem [shape: s32[16,1], index: 1, kind: input, shape index: {}]   ;;  %s345_s2 = inlined_call_operand.vmem [shape: f32[2,1,1], index: 2, kind: output, shape index: {}]  }
   0x1 LB: > { %s316_s10 = sadd.s32 4294967295, %s292_s9   ;;  %p266_p0 = scmp.ge.s32.totalorder %s292_s9, 1  ;;  %s292_s9 = sphi %s310_s9, %s12_s9  }
   0x2   : > { %p120_p1 = scmp.lt.s32.totalorder %s292_s9, 3 }
   0x4   : > { %p121_p2 = pnand %p266_p0, %p120_p1 }
   0x5   : > { %p143_p3 = scmp.lt.s32.totalorder (!%p121_p2), %s316_s10, 1  ;;  %s269_s19 = sshll.u32 (!%p121_p2), %s316_s10, 3 }
   0x6   : > { %124 = sbr.rel (%p121_p2) target bundleno = 352 (0x160), region = 28 }
   0xb   : > { %v294_v0 = vmov 0   ;;  %s322_s11 = scalar_select %p143_p3, %s316_s10, 1  ;;  %vm156_vm0 = vcmask 39936   ;;  %v172_v7 = vlaneseq  ;;  %v191_v22 = vstv %s269_s19 }
   0xc   : > { %281 = vset.pattern.permute.xlu0 %v294_v0  ;;  %vm201_vm3 = vcmask 0  }
   0xd   : > { %s267_s12 = sshll.u32 %s322_s11, 3  ;;  %v173_v8 = vand.u32 127, %v172_v7  ;;  %v189_v19 = vshrl.u32 %v172_v7, 7  ;;  %s153_s22 = scalar_lea.vmem %s345_s2, %s322_s11 }
   0xe   : > { %s146_s15 = scalar_lea.vmem %s343_s0, %s267_s12  ;;  %s150_s18 = scalar_lea.vmem %s344_s1, %s267_s12 }
   0xf   : > { %v154_v1 = vld [vmem:[%s146_s15] sm:$0xff]  ;;  %v192_v25 = vadd.s32 %v191_v22, %v189_v19 }
  0x10   : > { %v157_v2 = vsel %vm156_vm0, %v154_v1, -inf  ;;  %v155_v3 = vld [vmem:[%s150_s18] sm:$0xff]  ;;  %v169_v12 = vsel %vm156_vm0, %v154_v1, 0.0 }
  0x11   : > { %158 = vmax.xlane.f32.xlu0 %v157_v2  ;;  %vm193_vm2 = vcmp.lt.s32.totalorder %v192_v25, 16 }
  0x27   : > { %175 = vperm.xlu0 %281, %v155_v3  }
  0x9a   : > { %v159_v4 = vpop.xlane.xlu0 %158 }
  0x9b   : > { %v160_v5 = vsub.f32 %v154_v1, %v159_v4 }
  0x9d   : > { %v161_v6 = vmul.f32 1.442695, %v160_v5 }
  0x9f   : > { %282 = vpow2.f32 %v161_v6 }
  0xa2   : > { %v176_v9 = vpop.permute.xlu0 %175 }
  0xa3   : > { %vm177_vm1 = vcmp.eq.s32.totalorder %v173_v8, %v176_v9 }
  0xa4   : > { %v178_v13 = vsel %vm177_vm1, %v154_v1, 0.0 }
  0xa5   : > { %v179_v14 = vsel %vm156_vm0, %v178_v13, 0.0 }
  0xac   : > { %v283_v10 = vpop.eup %282 }
  0xad   : > { %v163_v11 = vsel %vm156_vm0, %v283_v10, 0.0 }
  0xae   : > { %164 = vadd.xlane.f32.xlu1 %v163_v11 }
  0xb2   : > { %170 = vadd.xlane.f32.xlu1 %v169_v12 }
  0xb6   : > { %180 = vadd.xlane.f32.xlu1 %v179_v14 }
 0x137   : > { %v165_v15 = vpop.xlane.xlu1 %164 }
 0x138   : > { %284 = vlog2.f32 %v165_v15 }
 0x13b   : > { %v171_v16 = vpop.xlane.xlu1 %170 }
 0x13f   : > { %v181_v20 = vpop.xlane.xlu1 %180 }
 0x145   : > { %v285_v17 = vpop.eup %284 }
 0x146   : > { %v167_v18 = vmul.f32 0.6931472, %v285_v17 }
 0x148   : > { %v168_v21 = vadd.f32 %v167_v18, %v159_v4 }
 0x14a   : > { %v184_v23 = vmul.f32 5.0, %v168_v21  ;;  %v182_v24 = vsub.f32 %v181_v20, %v168_v21 }
 0x14c   : > { %v185_v26 = vsub.f32 %v171_v16, %v184_v23  ;;  %v183_v28 = vmul.f32 -0.875, %v182_v24 }
 0x14e   : > { %v186_v27 = vmul.f32 0.025, %v185_v26 }
 0x150   : > { %v187_v29 = vsub.f32 %v183_v28, %v186_v27 }
 0x152   : > { %v194_v30 = vsel %vm193_vm2, %v187_v29, 0.0 }
 0x153   : > { %v195_v31 = vrot.slane %v194_v30, 4 }
 0x155   : > { %v196_v32 = vadd.f32 %v195_v31, %v194_v30 }
 0x157   : > { %v197_v33 = vrot.slane %v196_v32, 2 }
 0x159   : > { %v198_v34 = vadd.f32 %v197_v33, %v196_v32 }
 0x15b   : > { %v199_v35 = vrot.slane %v198_v34, 1 }
 0x15d   : > { %v200_v36 = vadd.f32 %v199_v35, %v198_v34 }
 0x15f   : > { %202 = vst.msk [vmem:[%s153_s22] sm:$0x1] %vm201_vm3, %v200_v36 }
 0x160 PF: > { %s12_s9 = sadd.s32 1, %s292_s9  }
 0x161   : > { %p9_p4 = scmp.ge.s32.totalorder %s12_s9, 4  }
 0x163   :  { %11 = sbr.rel (!%p9_p4) target bundleno = 1 (0x1), region = 61 }

</bundles_post_ra>
